<compile_context>
chip_gen: v7x
topology: tpu7x:2x2x1
jax: 0.10.0
libtpu: 0.0.40
codegen_flags: <defaults>
</compile_context>

<pallas_src>
import functools

import jax
import jax.numpy as jnp
import numpy as np
from jax import lax
from jax.experimental import pallas as pl
from jax.experimental.pallas import tpu as pltpu


# ------------------------------ kernel ------------------------------------- #

def _nonlocal_kernel(x_ref, xq_ref, w_ref, b_ref, out_ref, *, bb, c, ci,
                     mm_dtype):
    # x_ref  : (bb*c, n)        activations, channels-first, tokens on lanes (f32)
    # xq_ref : (bb*c, 4*ns)     4 lane-packed stride-2 shifted views of x
    # w_ref  : (bb*4ci, bb*c)   [bdiag(w_theta); bdiag([w_g/Ns; w_phi]); bdiag(w_w_eff^T)]
    # b_ref  : (bb*(3ci+c), 1)  [b_theta; b_g/Ns; b_phi; b_w_eff] tiled per batch
    # out_ref: (bb*c, n)
    n = x_ref.shape[1]
    ns = xq_ref.shape[1] // 4
    rt = bb * ci
    rgp = bb * 2 * ci

    x = x_ref[...]                                      # f32, kept for residual
    x_mm = x.astype(mm_dtype)
    xq = xq_ref[...]                                    # mm_dtype

    wt = w_ref[0:rt, :]                                 # block-diag theta
    wgp = w_ref[rt:rt + rgp, :]                         # block-diag [g/Ns; phi]
    wwt = w_ref[rt + rgp:rt + rgp + rt, :]              # block-diag W^T (BN folded)
    bt = b_ref[0:rt, :]
    bgp = b_ref[rt:rt + rgp, :]
    bw = b_ref[rt + rgp:rt + rgp + bb * c, :]

    # theta for all bb batches in one lane-dense matmul (block-diag weights).
    theta = jnp.dot(wt, x_mm, preferred_element_type=jnp.float32) + bt  # (bb*ci, n)

    # g/phi branch: conv1x1 + MaxPool2d(2,2) fused.  One lane-dense matmul over
    # the 4 lane-packed shifted views, then a 4-way max across the ns-wide lane
    # segments on the XLU (roll) + VPU.  Bias (and the folded 1/Ns on g) is
    # added after the max — it commutes.
    gp4 = jnp.dot(wgp, xq, preferred_element_type=jnp.float32)          # (bb*2ci, 4*ns)
    m = jnp.maximum(gp4, pltpu.roll(gp4, shift=2 * ns, axis=1))
    m = jnp.maximum(m, pltpu.roll(m, shift=3 * ns, axis=1))
    gp = m[:, :ns] + bgp                                                # (bb*2ci, ns)

    # Attention is batch-local: small unrolled loop with static (free) slices.
    ys = []
    for b in range(bb):
        th_b = theta[b * ci:(b + 1) * ci, :].astype(mm_dtype)           # (ci, n)
        g_b = gp[b * 2 * ci:b * 2 * ci + ci, :].astype(mm_dtype)        # (ci, ns)
        ph_b = gp[b * 2 * ci + ci:(b + 1) * 2 * ci, :].astype(mm_dtype)  # (ci, ns)
        # f^T[m, n] = sum_c phi[c, m] * theta[c, n]  -> (ns, n); no transpose,
        # and no explicit 1/Ns scale (already folded into the g weights).
        f_t = lax.dot_general(ph_b, th_b, (((0,), (0,)), ((), ())),
                              preferred_element_type=jnp.float32)
        ys.append(jnp.dot(g_b, f_t.astype(mm_dtype),
                          preferred_element_type=jnp.float32))          # (ci, n)
    y = jnp.concatenate(ys, axis=0) if bb > 1 else ys[0]                # (bb*ci, n)

    # W projection (BN affine folded) + residual, one lane-dense store.
    wy = lax.dot_general(wwt, y.astype(mm_dtype), (((0,), (0,)), ((), ())),
                         preferred_element_type=jnp.float32) + bw       # (bb*c, n)
    out_ref[...] = (wy + x).astype(out_ref.dtype)


# ------------------------------ wrapper ------------------------------------ #

def nonlocal_block(x_nchw, p, *, batch_block=None, matmul_dtype=jnp.float32):
    B, C, H, W = x_nchw.shape
    Ci = p["w_theta"].shape[0]
    assert H % 2 == 0 and W % 2 == 0, "MaxPool2d(2,2) sub-sampling needs even H, W"
    N = H * W
    Ns = (H // 2) * (W // 2)

    bb = B if batch_block is None else batch_block
    assert B % bb == 0
    grid = (B // bb,)
    # When the batch is tiled, activation blocks must stay sublane-aligned.
    assert grid[0] == 1 or (bb * C) % 8 == 0

    # Free reshape only (no transpose): tokens on the lane axis.
    x_flat = x_nchw.reshape(B * C, N)

    # 4 shifted stride-2 views of x, lane-packed along the token axis, so the
    # pooled-branch projection is a single >=128-lane matmul in the kernel.
    # max_q conv1x1(x_q) == MaxPool2d(2,2)(conv1x1(x))  (bias commutes with max).
    quads = jnp.concatenate(
        [x_nchw[:, :, di::2, dj::2].reshape(B, C, Ns)
         for di in (0, 1) for dj in (0, 1)], axis=2)            # (B, C, 4*Ns)
    quads = quads.reshape(B * C, 4 * Ns).astype(matmul_dtype)

    # Fold BatchNorm2d (eval mode, general running stats) into the W projection:
    #   BN(w_w@y + b_w) = s*(w_w@y) + s*(b_w - mean) + beta,  s = gamma*rsqrt(var+eps)
    eps = 1e-5
    s = p["gamma"] / jnp.sqrt(p["running_var"] + eps)                     # (C,)
    w_w_eff = p["w_w"] * s[:, None]                                       # (C, Ci)
    b_w_eff = s * (p["b_w"][:, 0] - p["running_mean"]) + p["beta"]        # (C,)

    # Fold the 1/Ns attention normalisation into the g branch: (f/Ns)@g == f@(g/Ns).
    w_gp = jnp.concatenate([p["w_g"] / Ns, p["w_phi"]], axis=0)           # (2Ci, C)
    b_gp = jnp.concatenate([p["b_g"] / Ns, p["b_phi"]], axis=0)           # (2Ci, 1)

    # Pack ALL projections into one weight and one bias operand, block-diagonal
    # over the bb batch elements of a grid step (zero-MACs are free on the MXU
    # while bb*C <= 128), so each projection covers the whole batch block.
    eye = jnp.eye(bb, dtype=jnp.float32)
    bdiag = lambda m: jnp.kron(eye, m)
    w_packed = jnp.concatenate(
        [bdiag(p["w_theta"]), bdiag(w_gp), bdiag(w_w_eff.T)],
        axis=0).astype(matmul_dtype)                           # (bb*4Ci, bb*C)
    b_packed = jnp.concatenate(
        [jnp.tile(p["b_theta"], (bb, 1)), jnp.tile(b_gp, (bb, 1)),
         jnp.tile(b_w_eff[:, None], (bb, 1))], axis=0)         # (bb*(3Ci+C), 1)

    kernel = functools.partial(_nonlocal_kernel, bb=bb, c=C, ci=Ci,
                               mm_dtype=matmul_dtype)

    def full(arr):
        return pl.BlockSpec(arr.shape, lambda g: (0,) * arr.ndim)

    out_flat = pl.pallas_call(
        kernel,
        out_shape=jax.ShapeDtypeStruct((B * C, N), jnp.float32),
        grid_spec=pltpu.PrefetchScalarGridSpec(
            num_scalar_prefetch=0,
            grid=grid,
            in_specs=[
                pl.BlockSpec((bb * C, N), lambda g: (g, 0)),        # x
                pl.BlockSpec((bb * C, 4 * Ns), lambda g: (g, 0)),   # quads
                full(w_packed),                                     # weights
                full(b_packed),                                     # biases
            ],
            out_specs=pl.BlockSpec((bb * C, N), lambda g: (g, 0)),
        ),
        compiler_params=pltpu.CompilerParams(
            dimension_semantics=("parallel",)),
    )(x_flat, quads, w_packed, b_packed)

    return out_flat.reshape(B, C, H, W)       # free reshape back to NCHW


# -------------------------- params & reference ------------------------------ #

def make_params(key, C, Ci):
    ks = jax.random.split(key, 12)
    s = 0.2
    # 1x1 conv weights stored as (C_out, C_in) == PyTorch weight[:, :, 0, 0].
    return {
        "w_theta": s * jax.random.normal(ks[0], (Ci, C), jnp.float32),
        "b_theta": s * jax.random.normal(ks[1], (Ci, 1), jnp.float32),
        "w_g":     s * jax.random.normal(ks[2], (Ci, C), jnp.float32),
        "b_g":     s * jax.random.normal(ks[3], (Ci, 1), jnp.float32),
        "w_phi":   s * jax.random.normal(ks[4], (Ci, C), jnp.float32),
        "b_phi":   s * jax.random.normal(ks[5], (Ci, 1), jnp.float32),
        "w_w":     s * jax.random.normal(ks[6], (C, Ci), jnp.float32),
        "b_w":     s * jax.random.normal(ks[7], (C, 1), jnp.float32),
        # NOTE: PyTorch initializes the W-branch BN gamma/beta to 0 (identity
        # block at init).  We deliberately use non-trivial gamma/beta AND
        # non-default running stats so the full fused path (incl. the general
        # BN fold) is exercised, not just the residual.
        "gamma":        1.0 + 0.1 * jax.random.normal(ks[8], (C,), jnp.float32),
        "beta":         0.1 * jax.random.normal(ks[9], (C,), jnp.float32),
        "running_mean": 0.1 * jax.random.normal(ks[10], (C,), jnp.float32),
        "running_var":  1.0 + 0.2 * jnp.abs(
            jax.random.normal(ks[11], (C,), jnp.float32)),
    }


def reference(x, p):
    # Pure-JAX mirror of the PyTorch forward (NCHW, BN in eval mode).
    B, C, H, W = x.shape
    Ci = p["w_theta"].shape[0]
    hp = lax.Precision.HIGHEST   # keep the reference truly f32-accurate

    def conv1x1(t, w, b):
        return (jnp.einsum("bchw,kc->bkhw", t, w, precision=hp)
                + b[:, 0][None, :, None, None])

    def maxpool2(t):
        return t.reshape(B, -1, H // 2, 2, W // 2, 2).max(axis=(3, 5))

    g_x = maxpool2(conv1x1(x, p["w_g"], p["b_g"])).reshape(B, Ci, -1).transpose(0, 2, 1)
    theta_x = conv1x1(x, p["w_theta"], p["b_theta"]).reshape(B, Ci, -1).transpose(0, 2, 1)
    phi_x = maxpool2(conv1x1(x, p["w_phi"], p["b_phi"])).reshape(B, Ci, -1)
    f = jnp.einsum("bnc,bcm->bnm", theta_x, phi_x, precision=hp)
    f_div_C = f / f.shape[-1]
    y = jnp.einsum("bnm,bmc->bnc", f_div_C, g_x, precision=hp)
    y = y.transpose(0, 2, 1).reshape(B, Ci, H, W)
    W_y = conv1x1(y, p["w_w"], p["b_w"])
    scale = (p["gamma"] / jnp.sqrt(p["running_var"] + 1e-5))[None, :, None, None]
    shift = p["beta"][None, :, None, None]
    mean = p["running_mean"][None, :, None, None]
    return (W_y - mean) * scale + shift + x


# --------------------------------- main ------------------------------------- #

if __name__ == "__main__":
    key = jax.random.PRNGKey(0)
    kx, kp = jax.random.split(key)
    B, C, H, W = 2, 8, 16, 16            # in_channels=8 -> inter_channels=4
    x = jax.random.normal(kx, (B, C, H, W), jnp.float32)
    params = make_params(kp, C, C // 2)

    ref = reference(x, params)

    # f32 matmul-operand path: tight tolerance (f32 compute on both sides).
    out = jax.block_until_ready(nonlocal_block(x, params))
    assert out.shape == x.shape
    np.testing.assert_allclose(np.asarray(out), np.asarray(ref),
                               rtol=1e-5, atol=1e-4)

    # bf16 matmul-operand path (the MXU win at realistic N); f32 accumulation,
    # bias/residual/output stay f32.  Looser tolerance for bf16 rounding.
    out_bf16 = jax.block_until_ready(
        nonlocal_block(x, params, matmul_dtype=jnp.bfloat16))
    np.testing.assert_allclose(np.asarray(out_bf16), np.asarray(ref),
                               rtol=5e-2, atol=5e-2)

    print("KERNEL_OK")
</pallas_src>

<mosaic_0001>
module attributes {stable_mosaic.version = 11 : i64} {
  func.func @_nonlocal_kernel(%arg0: i32, %arg1: memref<16x256xf32, #tpu.memory_space<vmem>>, %arg2: memref<16x256xf32, #tpu.memory_space<vmem>>, %arg3: memref<32x16xf32, #tpu.memory_space<vmem>>, %arg4: memref<40x1xf32, #tpu.memory_space<vmem>>, %arg5: memref<16x256xf32, #tpu.memory_space<vmem>>) attributes {dimension_semantics = [#tpu.dimension_semantics<parallel>], iteration_bounds = array<i64: 1>, scalar_prefetch = 0 : i64, scratch_operands = 0 : i64, tpu.core_type = #tpu.core_type<tc>, window_params = [{transform_indices = @transform_0, window_bounds = array<i64: 16, 256>}, {transform_indices = @transform_1, window_bounds = array<i64: 16, 256>}, {pipeline_mode = #tpu.pipeline_mode<synchronous>, transform_indices = @transform_2, window_bounds = array<i64: 32, 16>}, {pipeline_mode = #tpu.pipeline_mode<synchronous>, transform_indices = @transform_3, window_bounds = array<i64: 40, 1>}, {transform_indices = @transform_4, window_bounds = array<i64: 16, 256>}]} {
    %c0 = arith.constant 0 : index
    %c0_0 = arith.constant 0 : index
    %0 = vector.load %arg1[%c0, %c0_0] : memref<16x256xf32, #tpu.memory_space<vmem>>, vector<16x256xf32>
    %c0_1 = arith.constant 0 : index
    %c0_2 = arith.constant 0 : index
    %1 = vector.load %arg2[%c0_1, %c0_2] : memref<16x256xf32, #tpu.memory_space<vmem>>, vector<16x256xf32>
    %c0_3 = arith.constant 0 : index
    %c0_4 = arith.constant 0 : index
    %2 = vector.load %arg3[%c0_3, %c0_4] : memref<32x16xf32, #tpu.memory_space<vmem>>, vector<8x16xf32>
    %c8 = arith.constant 8 : index
    %c0_5 = arith.constant 0 : index
    %3 = vector.load %arg3[%c8, %c0_5] : memref<32x16xf32, #tpu.memory_space<vmem>>, vector<16x16xf32>
    %c24 = arith.constant 24 : index
    %c0_6 = arith.constant 0 : index
    %4 = vector.load %arg3[%c24, %c0_6] : memref<32x16xf32, #tpu.memory_space<vmem>>, vector<8x16xf32>
    %c0_7 = arith.constant 0 : index
    %c0_8 = arith.constant 0 : index
    %5 = vector.load %arg4[%c0_7, %c0_8] : memref<40x1xf32, #tpu.memory_space<vmem>>, vector<8x1xf32>
    %c8_9 = arith.constant 8 : index
    %c0_10 = arith.constant 0 : index
    %6 = vector.load %arg4[%c8_9, %c0_10] : memref<40x1xf32, #tpu.memory_space<vmem>>, vector<16x1xf32>
    %c24_11 = arith.constant 24 : index
    %c0_12 = arith.constant 0 : index
    %7 = vector.load %arg4[%c24_11, %c0_12] : memref<40x1xf32, #tpu.memory_space<vmem>>, vector<16x1xf32>
    %cst = arith.constant dense<0.000000e+00> : vector<8x256xf32>
    %8 = tpu.matmul %2, %0, %cst {dimension_numbers = #tpu.dot_dimension_numbers<[1], [0], [0], [1], [0, 0, 1, 1], [], []>} : vector<8x16xf32>, vector<16x256xf32>, vector<8x256xf32> -> vector<8x256xf32>
    %9 = vector.broadcast %5 : vector<8x1xf32> to vector<8x256xf32>
    %10 = arith.addf %8, %9 : vector<8x256xf32>
    %cst_13 = arith.constant dense<0.000000e+00> : vector<16x256xf32>
    %11 = tpu.matmul %3, %1, %cst_13 {dimension_numbers = #tpu.dot_dimension_numbers<[1], [0], [0], [1], [0, 0, 1, 1], [], []>} : vector<16x16xf32>, vector<16x256xf32>, vector<16x256xf32> -> vector<16x256xf32>
    %c128_i32 = arith.constant 128 : i32
    %12 = tpu.dynamic_rotate %11 by %c128_i32 dim 1 : vector<16x256xf32>, i32 -> vector<16x256xf32>
    %13 = arith.maximumf %11, %12 : vector<16x256xf32>
    %c192_i32 = arith.constant 192 : i32
    %14 = tpu.dynamic_rotate %13 by %c192_i32 dim 1 : vector<16x256xf32>, i32 -> vector<16x256xf32>
    %15 = arith.maximumf %13, %14 : vector<16x256xf32>
    %16 = vector.extract_strided_slice %15 {offsets = [0, 0], sizes = [16, 64], strides = [1, 1]} : vector<16x256xf32> to vector<16x64xf32>
    %17 = vector.broadcast %6 : vector<16x1xf32> to vector<16x64xf32>
    %18 = arith.addf %16, %17 : vector<16x64xf32>
    %19 = vector.extract_strided_slice %10 {offsets = [0, 0], sizes = [4, 256], strides = [1, 1]} : vector<8x256xf32> to vector<4x256xf32>
    %20 = vector.extract_strided_slice %18 {offsets = [0, 0], sizes = [4, 64], strides = [1, 1]} : vector<16x64xf32> to vector<4x64xf32>
    %21 = vector.extract_strided_slice %18 {offsets = [4, 0], sizes = [4, 64], strides = [1, 1]} : vector<16x64xf32> to vector<4x64xf32>
    %cst_14 = arith.constant dense<0.000000e+00> : vector<64x256xf32>
    %22 = tpu.matmul %21, %19, %cst_14 {dimension_numbers = #tpu.dot_dimension_numbers<[0], [0], [1], [1], [0, 1, 1, 1], [], []>} : vector<4x64xf32>, vector<4x256xf32>, vector<64x256xf32> -> vector<64x256xf32>
    %cst_15 = arith.constant dense<0.000000e+00> : vector<4x256xf32>
    %23 = tpu.matmul %20, %22, %cst_15 {dimension_numbers = #tpu.dot_dimension_numbers<[1], [0], [0], [1], [0, 0, 1, 1], [], []>} : vector<4x64xf32>, vector<64x256xf32>, vector<4x256xf32> -> vector<4x256xf32>
    %24 = vector.extract_strided_slice %10 {offsets = [4, 0], sizes = [4, 256], strides = [1, 1]} : vector<8x256xf32> to vector<4x256xf32>
    %25 = vector.extract_strided_slice %18 {offsets = [8, 0], sizes = [4, 64], strides = [1, 1]} : vector<16x64xf32> to vector<4x64xf32>
    %26 = vector.extract_strided_slice %18 {offsets = [12, 0], sizes = [4, 64], strides = [1, 1]} : vector<16x64xf32> to vector<4x64xf32>
    %cst_16 = arith.constant dense<0.000000e+00> : vector<64x256xf32>
    %27 = tpu.matmul %26, %24, %cst_16 {dimension_numbers = #tpu.dot_dimension_numbers<[0], [0], [1], [1], [0, 1, 1, 1], [], []>} : vector<4x64xf32>, vector<4x256xf32>, vector<64x256xf32> -> vector<64x256xf32>
    %cst_17 = arith.constant dense<0.000000e+00> : vector<4x256xf32>
    %28 = tpu.matmul %25, %27, %cst_17 {dimension_numbers = #tpu.dot_dimension_numbers<[1], [0], [0], [1], [0, 0, 1, 1], [], []>} : vector<4x64xf32>, vector<64x256xf32>, vector<4x256xf32> -> vector<4x256xf32>
    %29 = tpu.concatenate %23, %28 in 0 : vector<4x256xf32>, vector<4x256xf32> -> vector<8x256xf32>
    %cst_18 = arith.constant dense<0.000000e+00> : vector<16x256xf32>
    %30 = tpu.matmul %4, %29, %cst_18 {dimension_numbers = #tpu.dot_dimension_numbers<[0], [0], [1], [1], [0, 1, 1, 1], [], []>} : vector<8x16xf32>, vector<8x256xf32>, vector<16x256xf32> -> vector<16x256xf32>
    %31 = vector.broadcast %7 : vector<16x1xf32> to vector<16x256xf32>
    %32 = arith.addf %30, %31 : vector<16x256xf32>
    %33 = arith.addf %32, %0 : vector<16x256xf32>
    %c0_19 = arith.constant 0 : index
    %c0_20 = arith.constant 0 : index
    %34 = vector.load %arg5[%c0_19, %c0_20] : memref<16x256xf32, #tpu.memory_space<vmem>>, vector<16x256xf32>
    tpu.vector_store %arg5[%c0_19, %c0_20], %33 {strides = array<i32>} : memref<16x256xf32, #tpu.memory_space<vmem>>, vector<16x256xf32>,
    return
  }
  func.func @transform_0(%arg0: i32) -> (i32, i32) {
    %c0_i32 = arith.constant 0 : i32
    %c0_i32_0 = arith.constant 0 : i32
    return %arg0, %c0_i32 : i32, i32
  }
  func.func @transform_1(%arg0: i32) -> (i32, i32) {
    %c0_i32 = arith.constant 0 : i32
    %c0_i32_0 = arith.constant 0 : i32
    return %arg0, %c0_i32 : i32, i32
  }
  func.func @transform_2(%arg0: i32) -> (i32, i32) {
    %c0_i32 = arith.constant 0 : i32
    %c0_i32_0 = arith.constant 0 : i32
    %c0_i32_1 = arith.constant 0 : i32
    return %c0_i32, %c0_i32_0 : i32, i32
  }
  func.func @transform_3(%arg0: i32) -> (i32, i32) {
    %c0_i32 = arith.constant 0 : i32
    %c0_i32_0 = arith.constant 0 : i32
    %c0_i32_1 = arith.constant 0 : i32
    return %c0_i32, %c0_i32_0 : i32, i32
  }
  func.func @transform_4(%arg0: i32) -> (i32, i32) {
    %c0_i32 = arith.constant 0 : i32
    %c0_i32_0 = arith.constant 0 : i32
    return %arg0, %c0_i32 : i32, i32
  }
}

</mosaic_0001>

<bundles_post_ra>
// kernel: tpu_custom_call.1
= control target key start
LH: loop header
LB: loop body
LE: loop exit
PB: predicated region body
PF: predicated region fallthrough
CT: control target
= control target key end

     0   :  { %v982_v5 = vmov 0.0   ;;  %v983_v6 = vmov 0   ;;  %vm40_vm0 = vcmask 130048   ;;  %s1155_s0 = inlined_call_operand.vmem [shape: f32[16,256], index: 0, kind: input, shape index: {}]   ;;  %s1156_s1 = inlined_call_operand.vmem [shape: f32[16,256], index: 1, kind: input, shape index: {}]   ;;  %s1157_s2 = inlined_call_operand.vmem [shape: f32[32,16], index: 2, kind: input, shape index: {}]   ;;  %s1158_s3 = inlined_call_operand.vmem [shape: f32[40,1], index: 3, kind: input, shape index: {}]   ;;  %s1159_s4 = inlined_call_operand.hbm [shape: f32[16,256], index: 4, kind: output, shape index: {}]  }
   0x1   :  { %v23_v0 = vld [vmem:[%s1156_s1 + $0x8] sm:$0xff]  ;;  %v25_v1 = vld [vmem:[%s1156_s1 + $0x18] sm:$0xff]  ;;  %v22_v2 = vld [vmem:[%s1156_s1] sm:$0xff]  ;;  %185 = vmatprep.mubr.f32.mxu1 %v982_v5  ;;  %956 = vset.pattern.permute.xlu0 %v983_v6 }
   0x2   :  { %v914_v3 = vpack.c.bf16 %v25_v1, %v23_v0  ;;  %v24_v4 = vld [vmem:[%s1156_s1 + $0x10] sm:$0xff]  ;;  %v31_v8 = vld [vmem:[%s1158_s3 + $0x8] sm:$0xff]  ;;  %v1037_v10 = vld [vmem:[%s1155_s0 + $0x18] sm:$0xff]  ;;  %108 = vmatprep.mubr.f32.mxu0 %v982_v5  ;;  %957 = vset.pattern.permute.xlu1 %v983_v6 }
   0x3   :  { %v916_v7 = vpack.c.bf16 %v24_v4, %v22_v2  ;;  %v1032_v9 = vld [vmem:[%s1155_s0 + $0x8] sm:$0xff]  ;;  %210 = vperm.xlu0 %956, %v31_v8   ;;  %v1045_v12 = vld [vmem:[%s1155_s0] sm:$0xff]  ;;  %v1050_v13 = vld [vmem:[%s1155_s0 + $0x10] sm:$0xff] }
   0x4   :  { %915 = vmatprep.subr.bf16.mxu1 %v914_v3  ;;  %v910_v11 = vpack.c.bf16 %v1037_v10, %v1032_v9  ;;  %v27_v14 = vld [vmem:[%s1157_s2 + $0x8] sm:$0xff]  ;;  %v912_v15 = vpack.c.bf16 %v1050_v13, %v1045_v12 }
   0x5   :  { %917 = vmatpush1.bf16.msra.mxu1 %v916_v7 }
   0x6   :  { %9 = vsyncpa [#allocation3], 0  ;;  %911 = vmatprep.subr.bf16.mxu0 %v910_v11  ;;  %v26_v16 = vld [vmem:[%s1157_s2] sm:$0xff]  ;;  %v28_v17 = vld [vmem:[%s1157_s2 + $0x10] sm:$0xff]  ;;  %s984_s13 = smov 64   ;;  %vm280_vm1 = vcmask 1043456  }
   0x7   :  { %913 = vmatpush1.bf16.msra.mxu0 %v912_v15  ;;  %v30_v18 = vld [vmem:[%s1158_s3] sm:$0xff]  ;;  %v32_v23 = vld [vmem:[%s1158_s3 + $0x10] sm:$0xff]  ;;  %v29_v41 = vld [vmem:[%s1157_s2 + $0x18] sm:$0xff]  ;;  %vm255_vm2 = vcmask 31744   ;;  %vm400_vm3 = vcmask 523264   ;;  %vm775_vm4 = vcmask 64512  }
   0x8   :  { %884 = vmatmul.mubr.msk.f32.vlgmr.msra.gmra.mrb[0].mxu1 %vm40_vm0, %v27_v14  ;;  %37 = vperm.xlu1 %957, %v30_v18   ;;  %v34_v42 = vld [vmem:[%s1158_s3 + $0x20] sm:$0xff]  ;;  %v33_v43 = vld [vmem:[%s1158_s3 + $0x18] sm:$0xff]  ;;  %s985_s2 = smov [#allocation2]  }
   0x9   :  { %191 = vmatprep.mubr.f32.mxu1 %v982_v5  ;;  %s872_s3 = sshll.u32 %s985_s2, 4  ;;  %s873_s3 = int_to_ptr.vmem [resolvable:$true] %s872_s3 }
   0xa   :  { %883 = vmatmul.mubr.msk.f32.vlgmr.msra.gmra.mrb[0].mxu0 %vm40_vm0, %v26_v16  ;;  %s958_s22 = scalar_lea.vmem %s873_s3, 512  ;;  %p963_p1 = scmp.lt.s32.totalorder %s873_s3, %s873_s3 }
   0xb   :  { %351 = vmatprep.mubr.f32.mxu0 %v982_v5  ;;  %p959_p0 = scmp.ne.s32.totalorder %s873_s3, %s958_s22  ;;  %p964_p2 = scmp.lt.s32.totalorder %s958_s22, %s958_s22 }
   0xc   :  { %885 = vmatmul.mubr.msk.f32.gmra.mrb[2].mxu1 %vm40_vm0, %v28_v17 }
   0xd   :  { %467 = vmatprep.mubr.f32.mxu1 %v982_v5  ;;  %p965_p3 = por %p964_p2, %p963_p1 }
   0xf   :  { %p966_p4 = pnand %p965_p3, %p959_p0 }
  0x82   :  { %v211_v31 = vpop.permute.xlu0 %210 }
  0x87   :  { %v38_v27 = vpop.permute.xlu1 %37 }
  0xdb   :  { %v187_v19 = vpop.f32.mrb[0].mxu1 }
  0xdc   :  { %v189_v20 = vpop.f32.mrb[1].mxu1 }
  0xdd   :  { %v198_v21 = vmax.f32 %v187_v19, %v189_v20  ;;  %v110_v26 = vpop.f32.mrb[0].mxu0 }
  0xde   :  { %v1072_v28 = vadd.f32 %v110_v26, %v38_v27  ;;  %v112_v29 = vpop.f32.mrb[1].mxu0 }
  0xdf   :  { %200 = vrot.lane.b32.xlu0 %v198_v21, %s984_s13  ;;  %v193_v22 = vpop.f32.mrb[2].mxu1  ;;  %v1074_v30 = vadd.f32 %v112_v29, %v38_v27 }
  0xe0   :  { %v195_v24 = vpop.f32.mrb[3].mxu1  ;;  %v509_v20 = vrot.slane %v1072_v28, 4 }
  0xe1   :  { %v199_v25 = vmax.f32 %v193_v22, %v195_v24  ;;  %886 = vmatprep.subr.msk.mxu0 %vm280_vm1, %v1074_v30  ;;  %v510_v19 = vrot.slane %v1074_v30, 4 }
  0xe2   :  { %887 = vmatpush1.msk.msra.mxu0 %vm280_vm1, %v1072_v28 }
  0xe3   :  { %215 = vperm.xlu0 %956, %v32_v23  }
  0xe7   :  { %202 = vrot.lane.b32.xlu0 %v199_v25, %s984_s13 }
 0x151   :  { %v201_v32 = vpop.permute.xlu0 %200 }
 0x152   :  { %v206_v33 = vmax.f32 %v198_v21, %v201_v32 }
 0x154   :  { %v1080_v34 = vadd.f32 %v211_v31, %v206_v33 }
 0x156   :  { %v221_v35 = vrot.slane %v1080_v34, 4 }
 0x158   :  { %223 = vxpose.xlu1.b32.start.end [1/1] (short) (narrow) %v221_v35, 64 }
 0x162   :  { %v216_v36 = vpop.permute.xlu0 %215 }
 0x166   :  { %v203_v37 = vpop.permute.xlu0 %202 }
 0x167   :  { %v207_v38 = vmax.f32 %v199_v25, %v203_v37 }
 0x169   :  { %v1083_v39 = vadd.f32 %v216_v36, %v207_v38 }
 0x16b   :  { %v475_v40 = vrot.slane %v1083_v39, 4 }
 0x16d   :  { %477 = vxpose.xlu0.b32.start.end [1/1] (short) (narrow) %v475_v40, 64 }
 0x175   :  { %743 = vxpose.xlu1.b32.start.end [1/1] (short) (narrow) %v29_v41, 16 }
 0x197   :  { %740 = vperm.xlu1 %957, %v34_v42  }
 0x1b2   :  { %735 = vperm.xlu0 %956, %v33_v43  }
 0x1d8   :  { %v239_v44 = vpop.trf.xlu1 }
 0x1d9   :  { %888 = vmatmul.mubr.msk.f32.vlgmr.msra.gmra.mrb[2].mxu0 %vm255_vm2, %v239_v44 }
 0x1da   :  { %357 = vmatprep.mubr.f32.mxu0 %v982_v5 }
 0x1dc   :  { %v240_v45 = vpop.trf.xlu1 }
 0x1dd   :  { %889 = vmatmul.mubr.msk.f32.gmra.mrb[4].mxu0 %vm255_vm2, %v240_v45 }
 0x1de   :  { %363 = vmatprep.mubr.f32.mxu0 %v982_v5 }
 0x1e0   :  { %v241_v46 = vpop.trf.xlu1 }
 0x1e1   :  { %890 = vmatmul.mubr.msk.f32.gmra.mrb[6].mxu0 %vm255_vm2, %v241_v46 }
 0x1e2   :  { %369 = vmatprep.mubr.f32.mxu0 %v982_v5 }
 0x1e4   :  { %v242_v47 = vpop.trf.xlu1 }
 0x1e5   :  { %891 = vmatmul.mubr.msk.f32.gmra.mrb[8].mxu0 %vm255_vm2, %v242_v47 }
 0x1e6   :  { %375 = vmatprep.mubr.f32.mxu0 %v982_v5 }
 0x1e8   :  { %v243_v48 = vpop.trf.xlu1 }
 0x1e9   :  { %892 = vmatmul.mubr.msk.f32.gmra.mrb[10].mxu0 %vm255_vm2, %v243_v48 }
 0x1ea   :  { %381 = vmatprep.mubr.f32.mxu0 %v982_v5 }
 0x1ec   :  { %v244_v49 = vpop.trf.xlu1 }
 0x1ed   :  { %893 = vmatmul.mubr.msk.f32.gmra.mrb[12].mxu0 %vm255_vm2, %v244_v49  ;;  %v493_v8 = vpop.trf.xlu0 }
 0x1ee   :  { %387 = vmatprep.mubr.f32.mxu0 %v982_v5 }
 0x1f0   :  { %v245_v50 = vpop.trf.xlu1 }
 0x1f1   :  { %894 = vmatmul.mubr.msk.f32.gmra.mrb[14].mxu0 %vm255_vm2, %v245_v50  ;;  %v494_v18 = vpop.trf.xlu0 }
 0x1f2   :  { %393 = vmatprep.mubr.f32.mxu0 %v982_v5 }
 0x1f4   :  { %v246_v51 = vpop.trf.xlu1 }
 0x1f5   :  { %895 = vmatmul.mubr.msk.f32.gmra.mrb[16].mxu0 %vm255_vm2, %v246_v51  ;;  %v495_v21 = vpop.trf.xlu0 }
 0x1f6   :  { %718 = vmatprep.mubr.f32.mxu0 %v982_v5 }
 0x1f9   :  { %v496_v22 = vpop.trf.xlu0 }
 0x1fd   :  { %v497_v23 = vpop.trf.xlu0 }
 0x201   :  { %v498_v24 = vpop.trf.xlu0 }
 0x205   :  { %v499_v25 = vpop.trf.xlu0 }
 0x209   :  { %v500_v26 = vpop.trf.xlu0 }
 0x2ac   :  { %v353_v52 = vpop.f32.mrb[2].mxu0 }
 0x2ad   :  { %v355_v53 = vpop.f32.mrb[3].mxu0 }
 0x2b0   :  { %v359_v54 = vpop.f32.mrb[4].mxu0 }
 0x2b1   :  { %v920_v55 = vpack.c.bf16 %v359_v54, %v353_v52  ;;  %v361_v56 = vpop.f32.mrb[5].mxu0 }
 0x2b2   :  { %v918_v57 = vpack.c.bf16 %v361_v56, %v355_v53 }
 0x2b4   :  { %v365_v58 = vpop.f32.mrb[6].mxu0  ;;  %919 = vmatprep.subr.bf16.mxu1 %v918_v57 }
 0x2b5   :  { %v367_v59 = vpop.f32.mrb[7].mxu0  ;;  %921 = vmatpush1.bf16.msra.mxu1 %v920_v55 }
 0x2b8   :  { %v371_v60 = vpop.f32.mrb[8].mxu0 }
 0x2b9   :  { %v924_v61 = vpack.c.bf16 %v371_v60, %v365_v58  ;;  %v373_v62 = vpop.f32.mrb[9].mxu0 }
 0x2ba   :  { %v922_v63 = vpack.c.bf16 %v373_v62, %v367_v59  ;;  %v759_v59 = vpop.trf.xlu1 }
 0x2bc   :  { %v377_v0 = vpop.f32.mrb[10].mxu0  ;;  %923 = vmatprep.subr.bf16.mxu1 %v922_v63 }
 0x2bd   :  { %v379_v1 = vpop.f32.mrb[11].mxu0  ;;  %925 = vmatpush1.bf16.msra.mxu1 %v924_v61 }
 0x2be   :  { %v760_v61 = vpop.trf.xlu1 }
 0x2c0   :  { %v383_v2 = vpop.f32.mrb[12].mxu0 }
 0x2c1   :  { %v928_v3 = vpack.c.bf16 %v383_v2, %v377_v0  ;;  %v385_v4 = vpop.f32.mrb[13].mxu0 }
 0x2c2   :  { %v926_v6 = vpack.c.bf16 %v385_v4, %v379_v1 }
 0x2c4   :  { %v389_v7 = vpop.f32.mrb[14].mxu0  ;;  %927 = vmatprep.subr.bf16.mxu1 %v926_v6 }
 0x2c5   :  { %v391_v11 = vpop.f32.mrb[15].mxu0  ;;  %929 = vmatpush1.bf16.msra.mxu1 %v928_v3  ;;  %v741_v3 = vpop.permute.xlu1 %740 }
 0x2c8   :  { %v395_v14 = vpop.f32.mrb[16].mxu0 }
 0x2c9   :  { %v932_v15 = vpack.c.bf16 %v395_v14, %v389_v7  ;;  %v397_v16 = vpop.f32.mrb[17].mxu0 }
 0x2ca   :  { %v930_v17 = vpack.c.bf16 %v397_v16, %v391_v11 }
 0x2cc   :  { %931 = vmatprep.subr.bf16.mxu1 %v930_v17 }
 0x2cd   :  { %933 = vmatpush1.bf16.msra.mxu1 %v932_v15 }
 0x2ce   :  { %897 = vmatprep.subr.msk.mxu1 %vm280_vm1, %v510_v19 }
 0x2d0   :  { %896 = vmatmul.mubr.msk.f32.vlgmr.msra.gmra.mrb[4].mxu1 %vm400_vm3, %v1080_v34 }
 0x2d1   :  { %898 = vmatpush1.msk.msra.mxu1 %vm280_vm1, %v509_v20  ;;  %603 = vmatprep.mubr.f32.mxu1 %v982_v5 }
 0x2d4   :  { %899 = vmatmul.mubr.msk.f32.vlgmr.msra.gmra.mrb[6].mxu1 %vm255_vm2, %v493_v8 }
 0x2d5   :  { %609 = vmatprep.mubr.f32.mxu1 %v982_v5 }
 0x2d8   :  { %900 = vmatmul.mubr.msk.f32.gmra.mrb[8].mxu1 %vm255_vm2, %v494_v18 }
 0x2d9   :  { %615 = vmatprep.mubr.f32.mxu1 %v982_v5 }
 0x2dc   :  { %901 = vmatmul.mubr.msk.f32.gmra.mrb[10].mxu1 %vm255_vm2, %v495_v21 }
 0x2dd   :  { %621 = vmatprep.mubr.f32.mxu1 %v982_v5 }
 0x2e0   :  { %902 = vmatmul.mubr.msk.f32.gmra.mrb[12].mxu1 %vm255_vm2, %v496_v22 }
 0x2e1   :  { %627 = vmatprep.mubr.f32.mxu1 %v982_v5 }
 0x2e4   :  { %903 = vmatmul.mubr.msk.f32.gmra.mrb[14].mxu1 %vm255_vm2, %v497_v23 }
 0x2e5   :  { %633 = vmatprep.mubr.f32.mxu1 %v982_v5 }
 0x2e8   :  { %904 = vmatmul.mubr.msk.f32.gmra.mrb[16].mxu1 %vm255_vm2, %v498_v24 }
 0x2e9   :  { %639 = vmatprep.mubr.f32.mxu1 %v982_v5 }
 0x2ec   :  { %905 = vmatmul.mubr.msk.f32.gmra.mrb[18].mxu1 %vm255_vm2, %v499_v25 }
 0x2ed   :  { %645 = vmatprep.mubr.f32.mxu1 %v982_v5 }
 0x2f0   :  { %906 = vmatmul.mubr.msk.f32.gmra.mrb[20].mxu1 %vm255_vm2, %v500_v26 }
 0x3a3   :  { %v469_v27 = vpop.f32.mrb[4].mxu1 }
 0x3a4   :  { %v471_v28 = vpop.f32.mrb[5].mxu1 }
 0x3a7   :  { %v605_v29 = vpop.f32.mrb[6].mxu1 }
 0x3a8   :  { %v607_v30 = vpop.f32.mrb[7].mxu1 }
 0x3ab   :  { %v611_v31 = vpop.f32.mrb[8].mxu1 }
 0x3ac   :  { %v936_v32 = vpack.c.bf16 %v611_v31, %v605_v29  ;;  %v613_v33 = vpop.f32.mrb[9].mxu1 }
 0x3ad   :  { %v934_v34 = vpack.c.bf16 %v613_v33, %v607_v30 }
 0x3af   :  { %v617_v35 = vpop.f32.mrb[10].mxu1  ;;  %935 = vmatprep.subr.bf16.mxu0 %v934_v34 }
 0x3b0   :  { %v619_v36 = vpop.f32.mrb[11].mxu1  ;;  %937 = vmatpush1.bf16.msra.mxu0 %v936_v32 }
 0x3b3   :  { %v623_v37 = vpop.f32.mrb[12].mxu1 }
 0x3b4   :  { %v940_v38 = vpack.c.bf16 %v623_v37, %v617_v35  ;;  %v625_v40 = vpop.f32.mrb[13].mxu1 }
 0x3b5   :  { %v938_v41 = vpack.c.bf16 %v625_v40, %v619_v36 }
 0x3b7   :  { %v629_v42 = vpop.f32.mrb[14].mxu1  ;;  %939 = vmatprep.subr.bf16.mxu0 %v938_v41 }
 0x3b8   :  { %v631_v43 = vpop.f32.mrb[15].mxu1  ;;  %941 = vmatpush1.bf16.msra.mxu0 %v940_v38 }
 0x3bb   :  { %v635_v44 = vpop.f32.mrb[16].mxu1 }
 0x3bc   :  { %v944_v45 = vpack.c.bf16 %v635_v44, %v629_v42  ;;  %v637_v46 = vpop.f32.mrb[17].mxu1 }
 0x3bd   :  { %v942_v47 = vpack.c.bf16 %v637_v46, %v631_v43 }
 0x3bf   :  { %v641_v48 = vpop.f32.mrb[18].mxu1  ;;  %943 = vmatprep.subr.bf16.mxu0 %v942_v47 }
 0x3c0   :  { %v643_v49 = vpop.f32.mrb[19].mxu1  ;;  %945 = vmatpush1.bf16.msra.mxu0 %v944_v45 }
 0x3c3   :  { %v647_v50 = vpop.f32.mrb[20].mxu1 }
 0x3c4   :  { %v948_v51 = vpack.c.bf16 %v647_v50, %v641_v48  ;;  %v649_v52 = vpop.f32.mrb[21].mxu1 }
 0x3c5   :  { %v946_v53 = vpack.c.bf16 %v649_v52, %v643_v49 }
 0x3c7   :  { %947 = vmatprep.subr.bf16.mxu0 %v946_v53 }
 0x3c8   :  { %949 = vmatpush1.bf16.msra.mxu0 %v948_v51 }
 0x3cb   :  { %907 = vmatmul.mubr.msk.f32.vlgmr.msra.gmra.mrb[18].mxu0 %vm400_vm3, %v1083_v39  ;;  %v736_v39 = vpop.permute.xlu0 %735 }
 0x3cc   :  { %846 = vmatprep.mubr.f32.mxu0 %v982_v5 }
 0x49e   :  { %v720_v54 = vpop.f32.mrb[18].mxu0 }
 0x49f   :  { %v727_v55 = vrot.slane %v720_v54, 4  ;;  %v722_v56 = vpop.f32.mrb[19].mxu0 }
 0x4a0   :  { %v728_v57 = vrot.slane %v722_v56, 4 }
 0x4a1   :  { %v731_v58 = vsel %vm280_vm1, %v469_v27, %v727_v55 }
 0x4a2   :  { %v732_v60 = vsel %vm280_vm1, %v471_v28, %v728_v57 }
 0x4a3   :  { %782 = vmatprep.subr.mxu0 %v732_v60 }
 0x4a4   :  { %783 = vmatpush1.msra.mxu0 %v731_v58 }
 0x4a5   :  { %908 = vmatmul.mubr.msk.f32.vlgmr.msra.gmra.mrb[20].mxu0 %vm775_vm4, %v759_v59 }
 0x4a6   :  { %852 = vmatprep.mubr.f32.mxu0 %v982_v5 }
 0x4a9   :  { %909 = vmatmul.mubr.msk.f32.gmra.mrb[22].mxu0 %vm775_vm4, %v760_v61 }
 0x578   :  { %v848_v62 = vpop.f32.mrb[20].mxu0 }
 0x579   :  { %v849_v63 = vadd.f32 %v848_v62, %v736_v39  ;;  %v850_v0 = vpop.f32.mrb[21].mxu0 }
 0x57a   :  { %v851_v1 = vadd.f32 %v850_v0, %v736_v39 }
 0x57b   :  { %v859_v2 = vadd.f32 %v849_v63, %v1045_v12 }
 0x57c   :  { %v860_v4 = vadd.f32 %v851_v1, %v1032_v9  ;;  %v854_v6 = vpop.f32.mrb[22].mxu0 }
 0x57d   :  { %863 = vst [vmem:[#allocation2] sm:$0xff] %v859_v2  ;;  %v855_v7 = vadd.f32 %v854_v6, %v741_v3  ;;  %v856_v8 = vpop.f32.mrb[23].mxu0 }
 0x57e   :  { %864 = vst [vmem:[#allocation2 + $0x8] sm:$0xff] %v860_v4  ;;  %v857_v5 = vadd.f32 %v856_v8, %v741_v3 }
 0x57f   :  { %v861_v11 = vadd.f32 %v855_v7, %v1050_v13 }
 0x580   :  { %v862_v14 = vadd.f32 %v857_v5, %v1037_v10 }
 0x581   :  { %865 = vst [vmem:[#allocation2 + $0x10] sm:$0xff] %v861_v11 }
 0x582   :  { %866 = vst [vmem:[#allocation2 + $0x18] sm:$0xff] %v862_v14 }
 0x583   :  { %969 = shalt.err (!%p966_p4)
}
 0x584   :  { %s970_s25 = scalar_lea.hbm %s1159_s4, 512 }
 0x585   :  { %p971_p5 = scmp.ne.s32.totalorder %s1159_s4, %s970_s25  ;;  %p974_p6 = scmp.lt.u32.totalorder %s970_s25, %s1159_s4 }
 0x587   :  { %p976_p7 = pnand %p974_p6, %p971_p5 }
 0x589   :  { %979 = shalt.err (!%p976_p7)
}
 0x58a   :  { %s986_s29 = smov 256   ;;  %s987_s30 = smov 16  }
 0x58b   :  { %878 = dma.vmem_to_hbm [thread:$0]  %s873_s3, 512, %s1159_s4, [#allocation3], %s986_s29, %s986_s29, %s987_s30  }
 0x58c   :  { %980 = dma.done.wait [#allocation3], 512  }
 0x58d   :  { %981 = vsyncadd [#allocation3], 4294966784 }
 0x58e   :  { %882 = vsyncpa [#allocation3], 1 }

</bundles_post_ra>
